<compile_context>
chip_gen: v5e
topology: v5e:2x2
jax: 0.10.0
libtpu: 0.0.40
codegen_flags: <defaults>
</compile_context>

<pallas_src>
import jax
import jax.numpy as jnp
from jax.experimental import pallas as pl
from jax.experimental.pallas import tpu as pltpu

DILATIONS = (1, 2, 4)
KSIZE = 3
NUM_HEADS = 2
MAXPAD = max(DILATIONS) * ((KSIZE - 1) // 2)   # widest conv padding


def _mm(a, b):
    """a @ b with f32 accumulation on the MXU."""
    return jax.lax.dot_general(a, b, (((1,), (0,)), ((), ())),
                               preferred_element_type=jnp.float32)


def attdicem_kernel(x_ref, convw_ref, convb_ref, wq_ref, wk_ref, wv_ref,
                    bq_ref, bk_ref, bv_ref, wtail_ref, btail_ref,
                    o_ref, xpad_ref):
    L, Cin = x_ref.shape
    D, _, H = convw_ref.shape
    hd = wq_ref.shape[2]

    # Stage a zero-padded copy of this sequence in VMEM scratch.  Every dilated
    # conv tap then becomes a static row window of xpad (pad rows supply the
    # zero padding), instead of a shifted zeros+concat copy of x per tap.
    xpad_ref[...] = jnp.zeros_like(xpad_ref)
    xpad_ref[MAXPAD:MAXPAD + L, :] = x_ref[...]

    # ---- Dilated conv branches (+ ReLU), averaged over branches -------------
    # One (L, K*Cin) x (K*Cin, H) bf16 matmul per dilation (taps folded).
    y = jnp.zeros((L, H), jnp.float32)
    for di, d in enumerate(DILATIONS):
        taps = [xpad_ref[MAXPAD + (k - 1) * d: MAXPAD + (k - 1) * d + L, :]
                for k in range(KSIZE)]
        xs = jnp.concatenate(taps, axis=1).astype(jnp.bfloat16)   # (L, K*Cin)
        acc = _mm(xs, convw_ref[di]) + convb_ref[di]              # (L, H) f32
        y = y + jnp.maximum(acc, 0.0)
    y = y * (1.0 / float(D))
    yb = y.astype(jnp.bfloat16)

    # ---- Multi-head self-attention + fused out_proj/mean-pool/fc ------------
    scale = 1.0 / float(hd) ** 0.5
    tail = jnp.zeros((1, hd), jnp.float32)
    for h in range(NUM_HEADS):
        qh = _mm(yb, wq_ref[h]) + bq_ref[h]                       # (L, hd) f32
        kh = _mm(yb, wk_ref[h]) + bk_ref[h]
        vh = _mm(yb, wv_ref[h]) + bv_ref[h]
        s = jax.lax.dot_general((qh * scale).astype(jnp.bfloat16),
                                kh.astype(jnp.bfloat16),
                                (((1,), (1,)), ((), ())),
                                preferred_element_type=jnp.float32)  # (L, L)
        s = s - jnp.max(s, axis=-1, keepdims=True)
        p = jnp.exp(s)
        p = p * pl.reciprocal(jnp.sum(p, axis=-1, keepdims=True), approx=True)
        oh = _mm(p.astype(jnp.bfloat16), vh.astype(jnp.bfloat16))   # (L, hd)
        pooled = jnp.sum(oh, axis=0, keepdims=True) * (1.0 / float(L))  # (1,hd)
        tail = tail + pooled * wtail_ref[h]                        # fused tail
    o_ref[...] = (jnp.sum(tail, axis=1, keepdims=True)
                  + btail_ref[...]).astype(o_ref.dtype)            # (1, 1)


def attdicem_forward(x, params):
    convw, convb, inw, inb, outw, outb, fcw, fcb = params
    B, L, Cin = x.shape
    D, H, _, K = convw.shape
    hd = H // NUM_HEADS

    # --- one-time weight re-layout / pre-cast (outside the kernel) -----------
    # conv: (D, H, Cin, K) -> (D, K*Cin, H) bf16 so each branch is one matmul.
    convw_s = jnp.transpose(convw, (0, 3, 2, 1)).reshape(D, K * Cin, H)
    convw_s = convw_s.astype(jnp.bfloat16)
    convb_r = convb.reshape(D, 1, H).astype(jnp.float32)

    def per_head(w2d):                         # (H, H) -> (NH, H, hd)
        return jnp.transpose(w2d.reshape(NUM_HEADS, hd, H), (0, 2, 1)
                             ).astype(jnp.bfloat16)
    wq = per_head(inw[0:H]);      wk = per_head(inw[H:2 * H])
    wv = per_head(inw[2 * H:3 * H])
    bq = inb[:, 0:H].reshape(NUM_HEADS, 1, hd).astype(jnp.float32)
    bk = inb[:, H:2 * H].reshape(NUM_HEADS, 1, hd).astype(jnp.float32)
    bv = inb[:, 2 * H:3 * H].reshape(NUM_HEADS, 1, hd).astype(jnp.float32)

    # Fold out_proj + mean-pool + fc:  out = mean_t(concat_h oh) @ (fcw@outw).T
    #                                        + (outb @ fcw.T + fcb)
    wtail = (fcw @ outw).reshape(NUM_HEADS, 1, hd).astype(jnp.float32)
    btail = (outb @ fcw.T + fcb).astype(jnp.float32)               # (1, 1)

    grid_spec = pltpu.PrefetchScalarGridSpec(
        num_scalar_prefetch=0,
        grid=(B,),
        in_specs=[
            pl.BlockSpec((None, L, Cin), lambda b: (b, 0, 0)),           # x
            pl.BlockSpec((D, K * Cin, H), lambda b: (0, 0, 0)),          # convw
            pl.BlockSpec((D, 1, H), lambda b: (0, 0, 0)),                # convb
            pl.BlockSpec((NUM_HEADS, H, hd), lambda b: (0, 0, 0)),       # wq
            pl.BlockSpec((NUM_HEADS, H, hd), lambda b: (0, 0, 0)),       # wk
            pl.BlockSpec((NUM_HEADS, H, hd), lambda b: (0, 0, 0)),       # wv
            pl.BlockSpec((NUM_HEADS, 1, hd), lambda b: (0, 0, 0)),       # bq
            pl.BlockSpec((NUM_HEADS, 1, hd), lambda b: (0, 0, 0)),       # bk
            pl.BlockSpec((NUM_HEADS, 1, hd), lambda b: (0, 0, 0)),       # bv
            pl.BlockSpec((NUM_HEADS, 1, hd), lambda b: (0, 0, 0)),       # wtail
            pl.BlockSpec((1, 1), lambda b: (0, 0)),                      # btail
        ],
        out_specs=pl.BlockSpec((None, 1, 1), lambda b: (b, 0, 0)),
        scratch_shapes=[pltpu.VMEM((L + 2 * MAXPAD, Cin), jnp.float32)],
    )

    out = pl.pallas_call(
        attdicem_kernel,
        out_shape=jax.ShapeDtypeStruct((B, 1, 1), jnp.float32),
        grid_spec=grid_spec,
        compiler_params=pltpu.CompilerParams(
            dimension_semantics=("parallel",),        # shard batch across TCs
            vmem_limit_bytes=32 * 1024 * 1024,        # safe on v5e/v6e/v7x
        ),
    )(x, convw_s, convb_r, wq, wk, wv, bq, bk, bv, wtail, btail)
    return out.reshape(B, 1)


def attdicem_reference(x, params):
    """Pure-JAX (f32) reference mirroring the PyTorch forward pass."""
    convw, convb, inw, inb, outw, outb, fcw, fcb = params
    B, L, Cin = x.shape
    H = convw.shape[1]
    xt = jnp.transpose(x, (0, 2, 1))                         # (B, Cin, L)
    branches = []
    for di, d in enumerate(DILATIONS):
        y = jax.lax.conv_general_dilated(
            xt, convw[di], window_strides=(1,), padding=[(d, d)],
            rhs_dilation=(d,), dimension_numbers=("NCH", "OIH", "NCH"))
        y = y + convb[di][:, None]
        branches.append(jax.nn.relu(y))
    y = jnp.mean(jnp.stack(branches, axis=-1), axis=-1)       # (B, H, L)
    y = jnp.transpose(y, (0, 2, 1))                           # (B, L, H)
    qkv = y @ inw.T + inb
    q, k, v = jnp.split(qkv, 3, axis=-1)
    hd = H // NUM_HEADS
    heads = []
    for h in range(NUM_HEADS):
        qh = q[..., h * hd:(h + 1) * hd] / jnp.sqrt(float(hd))
        kh = k[..., h * hd:(h + 1) * hd]
        vh = v[..., h * hd:(h + 1) * hd]
        s = jnp.einsum("bld,bmd->blm", qh, kh)
        p = jax.nn.softmax(s, axis=-1)
        heads.append(jnp.einsum("blm,bmd->bld", p, vh))
    att = jnp.concatenate(heads, axis=-1) @ outw.T + outb
    pooled = jnp.mean(att, axis=1)
    return pooled @ fcw.T + fcb


def make_params(key, input_size, hidden_size):
    ks = jax.random.split(key, 8)
    D = len(DILATIONS)
    H = hidden_size
    scale = 0.1
    convw = scale * jax.random.normal(ks[0], (D, H, input_size, KSIZE), jnp.float32)
    convb = scale * jax.random.normal(ks[1], (D, H), jnp.float32)
    inw = scale * jax.random.normal(ks[2], (3 * H, H), jnp.float32)
    inb = scale * jax.random.normal(ks[3], (1, 3 * H), jnp.float32)
    outw = scale * jax.random.normal(ks[4], (H, H), jnp.float32)
    outb = scale * jax.random.normal(ks[5], (1, H), jnp.float32)
    fcw = scale * jax.random.normal(ks[6], (1, H), jnp.float32)
    fcb = scale * jax.random.normal(ks[7], (1, 1), jnp.float32)
    return (convw, convb, inw, inb, outw, outb, fcw, fcb)


if __name__ == "__main__":
    B, L, INPUT_SIZE, HIDDEN = 2, 8, 4, 32

    key = jax.random.PRNGKey(0)
    kx, kp = jax.random.split(key)
    x = jax.random.normal(kx, (B, L, INPUT_SIZE), jnp.float32)
    params = make_params(kp, INPUT_SIZE, HIDDEN)

    out = jax.block_until_ready(attdicem_forward(x, params))
    ref = jax.block_until_ready(attdicem_reference(x, params))

    assert out.shape == (B, 1), out.shape
    # bf16 MXU operands (f32 accumulation) + approx reciprocal -> relaxed tol
    # vs. the pure-f32 reference.
    assert jnp.allclose(out, ref, atol=2e-2, rtol=2e-2), (out, ref)
    print("KERNEL_OK")
</pallas_src>

<mosaic_0001>
module attributes {stable_mosaic.version = 11 : i64} {
  func.func @attdicem_kernel(%arg0: i32, %arg1: memref<1x8x4xf32, #tpu.memory_space<vmem>>, %arg2: memref<3x12x32xbf16, #tpu.memory_space<vmem>>, %arg3: memref<3x1x32xf32, #tpu.memory_space<vmem>>, %arg4: memref<2x32x16xbf16, #tpu.memory_space<vmem>>, %arg5: memref<2x32x16xbf16, #tpu.memory_space<vmem>>, %arg6: memref<2x32x16xbf16, #tpu.memory_space<vmem>>, %arg7: memref<2x1x16xf32, #tpu.memory_space<vmem>>, %arg8: memref<2x1x16xf32, #tpu.memory_space<vmem>>, %arg9: memref<2x1x16xf32, #tpu.memory_space<vmem>>, %arg10: memref<2x1x16xf32, #tpu.memory_space<vmem>>, %arg11: memref<1x1xf32, #tpu.memory_space<vmem>>, %arg12: memref<1x1x1xf32, #tpu.memory_space<vmem>>, %arg13: memref<16x4xf32, #tpu.memory_space<vmem>>) attributes {dimension_semantics = [#tpu.dimension_semantics<parallel>], iteration_bounds = array<i64: 2>, scalar_prefetch = 0 : i64, scratch_operands = 1 : i64, tpu.core_type = #tpu.core_type<tc>, window_params = [{transform_indices = @transform_0, window_bounds = array<i64: 1, 8, 4>}, {pipeline_mode = #tpu.pipeline_mode<synchronous>, transform_indices = @transform_1, window_bounds = array<i64: 3, 12, 32>}, {pipeline_mode = #tpu.pipeline_mode<synchronous>, transform_indices = @transform_2, window_bounds = array<i64: 3, 1, 32>}, {pipeline_mode = #tpu.pipeline_mode<synchronous>, transform_indices = @transform_3, window_bounds = array<i64: 2, 32, 16>}, {pipeline_mode = #tpu.pipeline_mode<synchronous>, transform_indices = @transform_4, window_bounds = array<i64: 2, 32, 16>}, {pipeline_mode = #tpu.pipeline_mode<synchronous>, transform_indices = @transform_5, window_bounds = array<i64: 2, 32, 16>}, {pipeline_mode = #tpu.pipeline_mode<synchronous>, transform_indices = @transform_6, window_bounds = array<i64: 2, 1, 16>}, {pipeline_mode = #tpu.pipeline_mode<synchronous>, transform_indices = @transform_7, window_bounds = array<i64: 2, 1, 16>}, {pipeline_mode = #tpu.pipeline_mode<synchronous>, transform_indices = @transform_8, window_bounds = array<i64: 2, 1, 16>}, {pipeline_mode = #tpu.pipeline_mode<synchronous>, transform_indices = @transform_9, window_bounds = array<i64: 2, 1, 16>}, {pipeline_mode = #tpu.pipeline_mode<synchronous>, transform_indices = @transform_10, window_bounds = array<i64: 1, 1>}, {transform_indices = @transform_11, window_bounds = array<i64: 1, 1, 1>}]} {
    %cst = arith.constant 0.000000e+00 : f32
    %0 = vector.broadcast %cst : f32 to vector<16x4xf32>
    %c0 = arith.constant 0 : index
    %c0_0 = arith.constant 0 : index
    %1 = vector.load %arg13[%c0, %c0_0] : memref<16x4xf32, #tpu.memory_space<vmem>>, vector<16x4xf32>
    tpu.vector_store %arg13[%c0, %c0_0], %0 {strides = array<i32>} : memref<16x4xf32, #tpu.memory_space<vmem>>, vector<16x4xf32>,
    %c0_1 = arith.constant 0 : index
    %c0_2 = arith.constant 0 : index
    %c0_3 = arith.constant 0 : index
    %2 = vector.load %arg1[%c0_1, %c0_2, %c0_3] : memref<1x8x4xf32, #tpu.memory_space<vmem>>, vector<1x8x4xf32>
    %3 = vector.shape_cast %2 : vector<1x8x4xf32> to vector<8x4xf32>
    %c4 = arith.constant 4 : index
    %c0_4 = arith.constant 0 : index
    %4 = vector.load %arg13[%c4, %c0_4] : memref<16x4xf32, #tpu.memory_space<vmem>>, vector<8x4xf32>
    tpu.vector_store %arg13[%c4, %c0_4], %3 {strides = array<i32>} : memref<16x4xf32, #tpu.memory_space<vmem>>, vector<8x4xf32>,
    %cst_5 = arith.constant 0.000000e+00 : f32
    %5 = vector.broadcast %cst_5 : f32 to vector<8x32xf32>
    %c3 = arith.constant 3 : index
    %c0_6 = arith.constant 0 : index
    %6 = vector.load %arg13[%c3, %c0_6] : memref<16x4xf32, #tpu.memory_space<vmem>>, vector<8x4xf32>
    %c4_7 = arith.constant 4 : index
    %c0_8 = arith.constant 0 : index
    %7 = vector.load %arg13[%c4_7, %c0_8] : memref<16x4xf32, #tpu.memory_space<vmem>>, vector<8x4xf32>
    %c5 = arith.constant 5 : index
    %c0_9 = arith.constant 0 : index
    %8 = vector.load %arg13[%c5, %c0_9] : memref<16x4xf32, #tpu.memory_space<vmem>>, vector<8x4xf32>
    %9 = tpu.concatenate %6, %7, %8 in 1 : vector<8x4xf32>, vector<8x4xf32>, vector<8x4xf32> -> vector<8x12xf32>
    %10 = arith.truncf %9 : vector<8x12xf32> to vector<8x12xbf16>
    %c0_10 = arith.constant 0 : index
    %c0_11 = arith.constant 0 : index
    %c0_12 = arith.constant 0 : index
    %11 = vector.load %arg2[%c0_10, %c0_11, %c0_12] : memref<3x12x32xbf16, #tpu.memory_space<vmem>>, vector<1x12x32xbf16>
    %12 = vector.shape_cast %11 : vector<1x12x32xbf16> to vector<12x32xbf16>
    %cst_13 = arith.constant dense<0.000000e+00> : vector<8x32xf32>
    %13 = tpu.matmul %10, %12, %cst_13 {dimension_numbers = #tpu.dot_dimension_numbers<[1], [0], [0], [1], [0, 0, 1, 1], [], []>} : vector<8x12xbf16>, vector<12x32xbf16>, vector<8x32xf32> -> vector<8x32xf32>
    %c0_14 = arith.constant 0 : index
    %c0_15 = arith.constant 0 : index
    %c0_16 = arith.constant 0 : index
    %14 = vector.load %arg3[%c0_14, %c0_15, %c0_16] : memref<3x1x32xf32, #tpu.memory_space<vmem>>, vector<1x1x32xf32>
    %15 = vector.shape_cast %14 : vector<1x1x32xf32> to vector<1x32xf32>
    %16 = vector.broadcast %15 : vector<1x32xf32> to vector<8x32xf32>
    %17 = arith.addf %13, %16 : vector<8x32xf32>
    %cst_17 = arith.constant 0.000000e+00 : f32
    %18 = vector.broadcast %cst_17 : f32 to vector<8x32xf32>
    %19 = arith.maximumf %17, %18 : vector<8x32xf32>
    %20 = arith.addf %5, %19 : vector<8x32xf32>
    %c2 = arith.constant 2 : index
    %c0_18 = arith.constant 0 : index
    %21 = vector.load %arg13[%c2, %c0_18] : memref<16x4xf32, #tpu.memory_space<vmem>>, vector<8x4xf32>
    %c4_19 = arith.constant 4 : index
    %c0_20 = arith.constant 0 : index
    %22 = vector.load %arg13[%c4_19, %c0_20] : memref<16x4xf32, #tpu.memory_space<vmem>>, vector<8x4xf32>
    %c6 = arith.constant 6 : index
    %c0_21 = arith.constant 0 : index
    %23 = vector.load %arg13[%c6, %c0_21] : memref<16x4xf32, #tpu.memory_space<vmem>>, vector<8x4xf32>
    %24 = tpu.concatenate %21, %22, %23 in 1 : vector<8x4xf32>, vector<8x4xf32>, vector<8x4xf32> -> vector<8x12xf32>
    %25 = arith.truncf %24 : vector<8x12xf32> to vector<8x12xbf16>
    %c1 = arith.constant 1 : index
    %c0_22 = arith.constant 0 : index
    %c0_23 = arith.constant 0 : index
    %26 = vector.load %arg2[%c1, %c0_22, %c0_23] : memref<3x12x32xbf16, #tpu.memory_space<vmem>>, vector<1x12x32xbf16>
    %27 = vector.shape_cast %26 : vector<1x12x32xbf16> to vector<12x32xbf16>
    %cst_24 = arith.constant dense<0.000000e+00> : vector<8x32xf32>
    %28 = tpu.matmul %25, %27, %cst_24 {dimension_numbers = #tpu.dot_dimension_numbers<[1], [0], [0], [1], [0, 0, 1, 1], [], []>} : vector<8x12xbf16>, vector<12x32xbf16>, vector<8x32xf32> -> vector<8x32xf32>
    %c1_25 = arith.constant 1 : index
    %c0_26 = arith.constant 0 : index
    %c0_27 = arith.constant 0 : index
    %29 = vector.load %arg3[%c1_25, %c0_26, %c0_27] : memref<3x1x32xf32, #tpu.memory_space<vmem>>, vector<1x1x32xf32>
    %30 = vector.shape_cast %29 : vector<1x1x32xf32> to vector<1x32xf32>
    %31 = vector.broadcast %30 : vector<1x32xf32> to vector<8x32xf32>
    %32 = arith.addf %28, %31 : vector<8x32xf32>
    %cst_28 = arith.constant 0.000000e+00 : f32
    %33 = vector.broadcast %cst_28 : f32 to vector<8x32xf32>
    %34 = arith.maximumf %32, %33 : vector<8x32xf32>
    %35 = arith.addf %20, %34 : vector<8x32xf32>
    %c0_29 = arith.constant 0 : index
    %c0_30 = arith.constant 0 : index
    %36 = vector.load %arg13[%c0_29, %c0_30] : memref<16x4xf32, #tpu.memory_space<vmem>>, vector<8x4xf32>
    %c4_31 = arith.constant 4 : index
    %c0_32 = arith.constant 0 : index
    %37 = vector.load %arg13[%c4_31, %c0_32] : memref<16x4xf32, #tpu.memory_space<vmem>>, vector<8x4xf32>
    %c8 = arith.constant 8 : index
    %c0_33 = arith.constant 0 : index
    %38 = vector.load %arg13[%c8, %c0_33] : memref<16x4xf32, #tpu.memory_space<vmem>>, vector<8x4xf32>
    %39 = tpu.concatenate %36, %37, %38 in 1 : vector<8x4xf32>, vector<8x4xf32>, vector<8x4xf32> -> vector<8x12xf32>
    %40 = arith.truncf %39 : vector<8x12xf32> to vector<8x12xbf16>
    %c2_34 = arith.constant 2 : index
    %c0_35 = arith.constant 0 : index
    %c0_36 = arith.constant 0 : index
    %41 = vector.load %arg2[%c2_34, %c0_35, %c0_36] : memref<3x12x32xbf16, #tpu.memory_space<vmem>>, vector<1x12x32xbf16>
    %42 = vector.shape_cast %41 : vector<1x12x32xbf16> to vector<12x32xbf16>
    %cst_37 = arith.constant dense<0.000000e+00> : vector<8x32xf32>
    %43 = tpu.matmul %40, %42, %cst_37 {dimension_numbers = #tpu.dot_dimension_numbers<[1], [0], [0], [1], [0, 0, 1, 1], [], []>} : vector<8x12xbf16>, vector<12x32xbf16>, vector<8x32xf32> -> vector<8x32xf32>
    %c2_38 = arith.constant 2 : index
    %c0_39 = arith.constant 0 : index
    %c0_40 = arith.constant 0 : index
    %44 = vector.load %arg3[%c2_38, %c0_39, %c0_40] : memref<3x1x32xf32, #tpu.memory_space<vmem>>, vector<1x1x32xf32>
    %45 = vector.shape_cast %44 : vector<1x1x32xf32> to vector<1x32xf32>
    %46 = vector.broadcast %45 : vector<1x32xf32> to vector<8x32xf32>
    %47 = arith.addf %43, %46 : vector<8x32xf32>
    %cst_41 = arith.constant 0.000000e+00 : f32
    %48 = vector.broadcast %cst_41 : f32 to vector<8x32xf32>
    %49 = arith.maximumf %47, %48 : vector<8x32xf32>
    %50 = arith.addf %35, %49 : vector<8x32xf32>
    %cst_42 = arith.constant 0.333333343 : f32
    %51 = vector.broadcast %cst_42 : f32 to vector<8x32xf32>
    %52 = arith.mulf %50, %51 : vector<8x32xf32>
    %53 = arith.truncf %52 : vector<8x32xf32> to vector<8x32xbf16>
    %cst_43 = arith.constant 0.000000e+00 : f32
    %54 = vector.broadcast %cst_43 : f32 to vector<1x16xf32>
    %c0_44 = arith.constant 0 : index
    %c0_45 = arith.constant 0 : index
    %c0_46 = arith.constant 0 : index
    %55 = vector.load %arg4[%c0_44, %c0_45, %c0_46] : memref<2x32x16xbf16, #tpu.memory_space<vmem>>, vector<1x32x16xbf16>
    %56 = vector.shape_cast %55 : vector<1x32x16xbf16> to vector<32x16xbf16>
    %cst_47 = arith.constant dense<0.000000e+00> : vector<8x16xf32>
    %57 = tpu.matmul %53, %56, %cst_47 {dimension_numbers = #tpu.dot_dimension_numbers<[1], [0], [0], [1], [0, 0, 1, 1], [], []>} : vector<8x32xbf16>, vector<32x16xbf16>, vector<8x16xf32> -> vector<8x16xf32>
    %c0_48 = arith.constant 0 : index
    %c0_49 = arith.constant 0 : index
    %c0_50 = arith.constant 0 : index
    %58 = vector.load %arg7[%c0_48, %c0_49, %c0_50] : memref<2x1x16xf32, #tpu.memory_space<vmem>>, vector<1x1x16xf32>
    %59 = vector.shape_cast %58 : vector<1x1x16xf32> to vector<1x16xf32>
    %60 = vector.broadcast %59 : vector<1x16xf32> to vector<8x16xf32>
    %61 = arith.addf %57, %60 : vector<8x16xf32>
    %c0_51 = arith.constant 0 : index
    %c0_52 = arith.constant 0 : index
    %c0_53 = arith.constant 0 : index
    %62 = vector.load %arg5[%c0_51, %c0_52, %c0_53] : memref<2x32x16xbf16, #tpu.memory_space<vmem>>, vector<1x32x16xbf16>
    %63 = vector.shape_cast %62 : vector<1x32x16xbf16> to vector<32x16xbf16>
    %cst_54 = arith.constant dense<0.000000e+00> : vector<8x16xf32>
    %64 = tpu.matmul %53, %63, %cst_54 {dimension_numbers = #tpu.dot_dimension_numbers<[1], [0], [0], [1], [0, 0, 1, 1], [], []>} : vector<8x32xbf16>, vector<32x16xbf16>, vector<8x16xf32> -> vector<8x16xf32>
    %c0_55 = arith.constant 0 : index
    %c0_56 = arith.constant 0 : index
    %c0_57 = arith.constant 0 : index
    %65 = vector.load %arg8[%c0_55, %c0_56, %c0_57] : memref<2x1x16xf32, #tpu.memory_space<vmem>>, vector<1x1x16xf32>
    %66 = vector.shape_cast %65 : vector<1x1x16xf32> to vector<1x16xf32>
    %67 = vector.broadcast %66 : vector<1x16xf32> to vector<8x16xf32>
    %68 = arith.addf %64, %67 : vector<8x16xf32>
    %c0_58 = arith.constant 0 : index
    %c0_59 = arith.constant 0 : index
    %c0_60 = arith.constant 0 : index
    %69 = vector.load %arg6[%c0_58, %c0_59, %c0_60] : memref<2x32x16xbf16, #tpu.memory_space<vmem>>, vector<1x32x16xbf16>
    %70 = vector.shape_cast %69 : vector<1x32x16xbf16> to vector<32x16xbf16>
    %cst_61 = arith.constant dense<0.000000e+00> : vector<8x16xf32>
    %71 = tpu.matmul %53, %70, %cst_61 {dimension_numbers = #tpu.dot_dimension_numbers<[1], [0], [0], [1], [0, 0, 1, 1], [], []>} : vector<8x32xbf16>, vector<32x16xbf16>, vector<8x16xf32> -> vector<8x16xf32>
    %c0_62 = arith.constant 0 : index
    %c0_63 = arith.constant 0 : index
    %c0_64 = arith.constant 0 : index
    %72 = vector.load %arg9[%c0_62, %c0_63, %c0_64] : memref<2x1x16xf32, #tpu.memory_space<vmem>>, vector<1x1x16xf32>
    %73 = vector.shape_cast %72 : vector<1x1x16xf32> to vector<1x16xf32>
    %74 = vector.broadcast %73 : vector<1x16xf32> to vector<8x16xf32>
    %75 = arith.addf %71, %74 : vector<8x16xf32>
    %cst_65 = arith.constant 2.500000e-01 : f32
    %76 = vector.broadcast %cst_65 : f32 to vector<8x16xf32>
    %77 = arith.mulf %61, %76 : vector<8x16xf32>
    %78 = arith.truncf %77 : vector<8x16xf32> to vector<8x16xbf16>
    %79 = arith.truncf %68 : vector<8x16xf32> to vector<8x16xbf16>
    %cst_66 = arith.constant dense<0.000000e+00> : vector<8x8xf32>
    %80 = tpu.matmul %78, %79, %cst_66 {dimension_numbers = #tpu.dot_dimension_numbers<[1], [1], [0], [0], [0, 0, 1, 0], [], []>} : vector<8x16xbf16>, vector<8x16xbf16>, vector<8x8xf32> -> vector<8x8xf32>
    %cst_67 = arith.constant dense<0xFF800000> : vector<8xf32>
    %81 = vector.multi_reduction <maximumf>, %80, %cst_67 [1] : vector<8x8xf32> to vector<8xf32>
    %82 = vector.shape_cast %81 : vector<8xf32> to vector<8x1xf32>
    %83 = vector.broadcast %82 : vector<8x1xf32> to vector<8x8xf32>
    %84 = arith.subf %80, %83 : vector<8x8xf32>
    %85 = math.exp %84 : vector<8x8xf32>
    %cst_68 = arith.constant dense<0.000000e+00> : vector<8xf32>
    %86 = vector.multi_reduction <add>, %85, %cst_68 [1] : vector<8x8xf32> to vector<8xf32>
    %87 = vector.shape_cast %86 : vector<8xf32> to vector<8x1xf32>
    %88 = tpu.reciprocal %87 {approx = true} : vector<8x1xf32> -> vector<8x1xf32>
    %89 = vector.broadcast %88 : vector<8x1xf32> to vector<8x8xf32>
    %90 = arith.mulf %85, %89 : vector<8x8xf32>
    %91 = arith.truncf %90 : vector<8x8xf32> to vector<8x8xbf16>
    %92 = arith.truncf %75 : vector<8x16xf32> to vector<8x16xbf16>
    %cst_69 = arith.constant dense<0.000000e+00> : vector<8x16xf32>
    %93 = tpu.matmul %91, %92, %cst_69 {dimension_numbers = #tpu.dot_dimension_numbers<[1], [0], [0], [1], [0, 0, 1, 1], [], []>} : vector<8x8xbf16>, vector<8x16xbf16>, vector<8x16xf32> -> vector<8x16xf32>
    %cst_70 = arith.constant dense<0.000000e+00> : vector<16xf32>
    %94 = vector.multi_reduction <add>, %93, %cst_70 [0] : vector<8x16xf32> to vector<16xf32>
    %95 = vector.shape_cast %94 : vector<16xf32> to vector<1x16xf32>
    %cst_71 = arith.constant 1.250000e-01 : f32
    %96 = vector.broadcast %cst_71 : f32 to vector<1x16xf32>
    %97 = arith.mulf %95, %96 : vector<1x16xf32>
    %c0_72 = arith.constant 0 : index
    %c0_73 = arith.constant 0 : index
    %c0_74 = arith.constant 0 : index
    %98 = vector.load %arg10[%c0_72, %c0_73, %c0_74] : memref<2x1x16xf32, #tpu.memory_space<vmem>>, vector<1x1x16xf32>
    %99 = vector.shape_cast %98 : vector<1x1x16xf32> to vector<1x16xf32>
    %100 = arith.mulf %97, %99 : vector<1x16xf32>
    %101 = arith.addf %54, %100 : vector<1x16xf32>
    %c1_75 = arith.constant 1 : index
    %c0_76 = arith.constant 0 : index
    %c0_77 = arith.constant 0 : index
    %102 = vector.load %arg4[%c1_75, %c0_76, %c0_77] : memref<2x32x16xbf16, #tpu.memory_space<vmem>>, vector<1x32x16xbf16>
    %103 = vector.shape_cast %102 : vector<1x32x16xbf16> to vector<32x16xbf16>
    %cst_78 = arith.constant dense<0.000000e+00> : vector<8x16xf32>
    %104 = tpu.matmul %53, %103, %cst_78 {dimension_numbers = #tpu.dot_dimension_numbers<[1], [0], [0], [1], [0, 0, 1, 1], [], []>} : vector<8x32xbf16>, vector<32x16xbf16>, vector<8x16xf32> -> vector<8x16xf32>
    %c1_79 = arith.constant 1 : index
    %c0_80 = arith.constant 0 : index
    %c0_81 = arith.constant 0 : index
    %105 = vector.load %arg7[%c1_79, %c0_80, %c0_81] : memref<2x1x16xf32, #tpu.memory_space<vmem>>, vector<1x1x16xf32>
    %106 = vector.shape_cast %105 : vector<1x1x16xf32> to vector<1x16xf32>
    %107 = vector.broadcast %106 : vector<1x16xf32> to vector<8x16xf32>
    %108 = arith.addf %104, %107 : vector<8x16xf32>
    %c1_82 = arith.constant 1 : index
    %c0_83 = arith.constant 0 : index
    %c0_84 = arith.constant 0 : index
    %109 = vector.load %arg5[%c1_82, %c0_83, %c0_84] : memref<2x32x16xbf16, #tpu.memory_space<vmem>>, vector<1x32x16xbf16>
    %110 = vector.shape_cast %109 : vector<1x32x16xbf16> to vector<32x16xbf16>
    %cst_85 = arith.constant dense<0.000000e+00> : vector<8x16xf32>
    %111 = tpu.matmul %53, %110, %cst_85 {dimension_numbers = #tpu.dot_dimension_numbers<[1], [0], [0], [1], [0, 0, 1, 1], [], []>} : vector<8x32xbf16>, vector<32x16xbf16>, vector<8x16xf32> -> vector<8x16xf32>
    %c1_86 = arith.constant 1 : index
    %c0_87 = arith.constant 0 : index
    %c0_88 = arith.constant 0 : index
    %112 = vector.load %arg8[%c1_86, %c0_87, %c0_88] : memref<2x1x16xf32, #tpu.memory_space<vmem>>, vector<1x1x16xf32>
    %113 = vector.shape_cast %112 : vector<1x1x16xf32> to vector<1x16xf32>
    %114 = vector.broadcast %113 : vector<1x16xf32> to vector<8x16xf32>
    %115 = arith.addf %111, %114 : vector<8x16xf32>
    %c1_89 = arith.constant 1 : index
    %c0_90 = arith.constant 0 : index
    %c0_91 = arith.constant 0 : index
    %116 = vector.load %arg6[%c1_89, %c0_90, %c0_91] : memref<2x32x16xbf16, #tpu.memory_space<vmem>>, vector<1x32x16xbf16>
    %117 = vector.shape_cast %116 : vector<1x32x16xbf16> to vector<32x16xbf16>
    %cst_92 = arith.constant dense<0.000000e+00> : vector<8x16xf32>
    %118 = tpu.matmul %53, %117, %cst_92 {dimension_numbers = #tpu.dot_dimension_numbers<[1], [0], [0], [1], [0, 0, 1, 1], [], []>} : vector<8x32xbf16>, vector<32x16xbf16>, vector<8x16xf32> -> vector<8x16xf32>
    %c1_93 = arith.constant 1 : index
    %c0_94 = arith.constant 0 : index
    %c0_95 = arith.constant 0 : index
    %119 = vector.load %arg9[%c1_93, %c0_94, %c0_95] : memref<2x1x16xf32, #tpu.memory_space<vmem>>, vector<1x1x16xf32>
    %120 = vector.shape_cast %119 : vector<1x1x16xf32> to vector<1x16xf32>
    %121 = vector.broadcast %120 : vector<1x16xf32> to vector<8x16xf32>
    %122 = arith.addf %118, %121 : vector<8x16xf32>
    %cst_96 = arith.constant 2.500000e-01 : f32
    %123 = vector.broadcast %cst_96 : f32 to vector<8x16xf32>
    %124 = arith.mulf %108, %123 : vector<8x16xf32>
    %125 = arith.truncf %124 : vector<8x16xf32> to vector<8x16xbf16>
    %126 = arith.truncf %115 : vector<8x16xf32> to vector<8x16xbf16>
    %cst_97 = arith.constant dense<0.000000e+00> : vector<8x8xf32>
    %127 = tpu.matmul %125, %126, %cst_97 {dimension_numbers = #tpu.dot_dimension_numbers<[1], [1], [0], [0], [0, 0, 1, 0], [], []>} : vector<8x16xbf16>, vector<8x16xbf16>, vector<8x8xf32> -> vector<8x8xf32>
    %cst_98 = arith.constant dense<0xFF800000> : vector<8xf32>
    %128 = vector.multi_reduction <maximumf>, %127, %cst_98 [1] : vector<8x8xf32> to vector<8xf32>
    %129 = vector.shape_cast %128 : vector<8xf32> to vector<8x1xf32>
    %130 = vector.broadcast %129 : vector<8x1xf32> to vector<8x8xf32>
    %131 = arith.subf %127, %130 : vector<8x8xf32>
    %132 = math.exp %131 : vector<8x8xf32>
    %cst_99 = arith.constant dense<0.000000e+00> : vector<8xf32>
    %133 = vector.multi_reduction <add>, %132, %cst_99 [1] : vector<8x8xf32> to vector<8xf32>
    %134 = vector.shape_cast %133 : vector<8xf32> to vector<8x1xf32>
    %135 = tpu.reciprocal %134 {approx = true} : vector<8x1xf32> -> vector<8x1xf32>
    %136 = vector.broadcast %135 : vector<8x1xf32> to vector<8x8xf32>
    %137 = arith.mulf %132, %136 : vector<8x8xf32>
    %138 = arith.truncf %137 : vector<8x8xf32> to vector<8x8xbf16>
    %139 = arith.truncf %122 : vector<8x16xf32> to vector<8x16xbf16>
    %cst_100 = arith.constant dense<0.000000e+00> : vector<8x16xf32>
    %140 = tpu.matmul %138, %139, %cst_100 {dimension_numbers = #tpu.dot_dimension_numbers<[1], [0], [0], [1], [0, 0, 1, 1], [], []>} : vector<8x8xbf16>, vector<8x16xbf16>, vector<8x16xf32> -> vector<8x16xf32>
    %cst_101 = arith.constant dense<0.000000e+00> : vector<16xf32>
    %141 = vector.multi_reduction <add>, %140, %cst_101 [0] : vector<8x16xf32> to vector<16xf32>
    %142 = vector.shape_cast %141 : vector<16xf32> to vector<1x16xf32>
    %cst_102 = arith.constant 1.250000e-01 : f32
    %143 = vector.broadcast %cst_102 : f32 to vector<1x16xf32>
    %144 = arith.mulf %142, %143 : vector<1x16xf32>
    %c1_103 = arith.constant 1 : index
    %c0_104 = arith.constant 0 : index
    %c0_105 = arith.constant 0 : index
    %145 = vector.load %arg10[%c1_103, %c0_104, %c0_105] : memref<2x1x16xf32, #tpu.memory_space<vmem>>, vector<1x1x16xf32>
    %146 = vector.shape_cast %145 : vector<1x1x16xf32> to vector<1x16xf32>
    %147 = arith.mulf %144, %146 : vector<1x16xf32>
    %148 = arith.addf %101, %147 : vector<1x16xf32>
    %cst_106 = arith.constant dense<0.000000e+00> : vector<1xf32>
    %149 = vector.multi_reduction <add>, %148, %cst_106 [1] : vector<1x16xf32> to vector<1xf32>
    %150 = vector.shape_cast %149 : vector<1xf32> to vector<1x1xf32>
    %c0_107 = arith.constant 0 : index
    %c0_108 = arith.constant 0 : index
    %151 = vector.load %arg11[%c0_107, %c0_108] : memref<1x1xf32, #tpu.memory_space<vmem>>, vector<1x1xf32>
    %152 = arith.addf %150, %151 : vector<1x1xf32>
    %c0_109 = arith.constant 0 : index
    %c0_110 = arith.constant 0 : index
    %c0_111 = arith.constant 0 : index
    %153 = vector.load %arg12[%c0_109, %c0_110, %c0_111] : memref<1x1x1xf32, #tpu.memory_space<vmem>>, vector<1x1x1xf32>
    %154 = vector.shape_cast %153 : vector<1x1x1xf32> to vector<1x1xf32>
    %155 = vector.shape_cast %152 : vector<1x1xf32> to vector<1x1x1xf32>
    tpu.vector_store %arg12[%c0_109, %c0_110, %c0_111], %155 {strides = array<i32>} : memref<1x1x1xf32, #tpu.memory_space<vmem>>, vector<1x1x1xf32>,
    return
  }
  func.func @transform_0(%arg0: i32) -> (i32, i32, i32) {
    %c0_i32 = arith.constant 0 : i32
    %c0_i32_0 = arith.constant 0 : i32
    %c0_i32_1 = arith.constant 0 : i32
    return %arg0, %c0_i32, %c0_i32_0 : i32, i32, i32
  }
  func.func @transform_1(%arg0: i32) -> (i32, i32, i32) {
    %c0_i32 = arith.constant 0 : i32
    %c0_i32_0 = arith.constant 0 : i32
    %c0_i32_1 = arith.constant 0 : i32
    %c0_i32_2 = arith.constant 0 : i32
    return %c0_i32, %c0_i32_0, %c0_i32_1 : i32, i32, i32
  }
  func.func @transform_2(%arg0: i32) -> (i32, i32, i32) {
    %c0_i32 = arith.constant 0 : i32
    %c0_i32_0 = arith.constant 0 : i32
    %c0_i32_1 = arith.constant 0 : i32
    %c0_i32_2 = arith.constant 0 : i32
    return %c0_i32, %c0_i32_0, %c0_i32_1 : i32, i32, i32
  }
  func.func @transform_3(%arg0: i32) -> (i32, i32, i32) {
    %c0_i32 = arith.constant 0 : i32
    %c0_i32_0 = arith.constant 0 : i32
    %c0_i32_1 = arith.constant 0 : i32
    %c0_i32_2 = arith.constant 0 : i32
    return %c0_i32, %c0_i32_0, %c0_i32_1 : i32, i32, i32
  }
  func.func @transform_4(%arg0: i32) -> (i32, i32, i32) {
    %c0_i32 = arith.constant 0 : i32
    %c0_i32_0 = arith.constant 0 : i32
    %c0_i32_1 = arith.constant 0 : i32
    %c0_i32_2 = arith.constant 0 : i32
    return %c0_i32, %c0_i32_0, %c0_i32_1 : i32, i32, i32
  }
  func.func @transform_5(%arg0: i32) -> (i32, i32, i32) {
    %c0_i32 = arith.constant 0 : i32
    %c0_i32_0 = arith.constant 0 : i32
    %c0_i32_1 = arith.constant 0 : i32
    %c0_i32_2 = arith.constant 0 : i32
    return %c0_i32, %c0_i32_0, %c0_i32_1 : i32, i32, i32
  }
  func.func @transform_6(%arg0: i32) -> (i32, i32, i32) {
    %c0_i32 = arith.constant 0 : i32
    %c0_i32_0 = arith.constant 0 : i32
    %c0_i32_1 = arith.constant 0 : i32
    %c0_i32_2 = arith.constant 0 : i32
    return %c0_i32, %c0_i32_0, %c0_i32_1 : i32, i32, i32
  }
  func.func @transform_7(%arg0: i32) -> (i32, i32, i32) {
    %c0_i32 = arith.constant 0 : i32
    %c0_i32_0 = arith.constant 0 : i32
    %c0_i32_1 = arith.constant 0 : i32
    %c0_i32_2 = arith.constant 0 : i32
    return %c0_i32, %c0_i32_0, %c0_i32_1 : i32, i32, i32
  }
  func.func @transform_8(%arg0: i32) -> (i32, i32, i32) {
    %c0_i32 = arith.constant 0 : i32
    %c0_i32_0 = arith.constant 0 : i32
    %c0_i32_1 = arith.constant 0 : i32
    %c0_i32_2 = arith.constant 0 : i32
    return %c0_i32, %c0_i32_0, %c0_i32_1 : i32, i32, i32
  }
  func.func @transform_9(%arg0: i32) -> (i32, i32, i32) {
    %c0_i32 = arith.constant 0 : i32
    %c0_i32_0 = arith.constant 0 : i32
    %c0_i32_1 = arith.constant 0 : i32
    %c0_i32_2 = arith.constant 0 : i32
    return %c0_i32, %c0_i32_0, %c0_i32_1 : i32, i32, i32
  }
  func.func @transform_10(%arg0: i32) -> (i32, i32) {
    %c0_i32 = arith.constant 0 : i32
    %c0_i32_0 = arith.constant 0 : i32
    %c0_i32_1 = arith.constant 0 : i32
    return %c0_i32, %c0_i32_0 : i32, i32
  }
  func.func @transform_11(%arg0: i32) -> (i32, i32, i32) {
    %c0_i32 = arith.constant 0 : i32
    %c0_i32_0 = arith.constant 0 : i32
    %c0_i32_1 = arith.constant 0 : i32
    return %arg0, %c0_i32, %c0_i32_0 : i32, i32, i32
  }
}

</mosaic_0001>

<bundles_post_ra>
// kernel: tpu_custom_call.1
= control target key start
LH: loop header
LB: loop body
LE: loop exit
PB: predicated region body
PF: predicated region fallthrough
CT: control target
= control target key end

     0   :  { %s1146_s19 = smov 0   ;;  %s1283_s0 = inlined_call_operand.vmem [shape: f32[2,8,4], index: 0, kind: input, shape index: {}]   ;;  %s1284_s1 = inlined_call_operand.vmem [shape: bf16[3,12,32], index: 1, kind: input, shape index: {}]   ;;  %s1285_s2 = inlined_call_operand.vmem [shape: f32[3,1,32], index: 2, kind: input, shape index: {}]   ;;  %s1286_s3 = inlined_call_operand.vmem [shape: bf16[2,32,16], index: 3, kind: input, shape index: {}]   ;;  %s1287_s4 = inlined_call_operand.vmem [shape: bf16[2,32,16], index: 4, kind: input, shape index: {}]   ;;  %s1288_s5 = inlined_call_operand.vmem [shape: bf16[2,32,16], index: 5, kind: input, shape index: {}]   ;;  %s1289_s6 = inlined_call_operand.vmem [shape: f32[2,1,16], index: 6, kind: input, shape index: {}]   ;;  %s1290_s7 = inlined_call_operand.vmem [shape: f32[2,1,16], index: 7, kind: input, shape index: {}]   ;;  %s1291_s8 = inlined_call_operand.vmem [shape: f32[2,1,16], index: 8, kind: input, shape index: {}]   ;;  %s1292_s9 = inlined_call_operand.vmem [shape: f32[2,1,16], index: 9, kind: input, shape index: {}]   ;;  %s1293_s10 = inlined_call_operand.<no memory space> [shape: f32[1,1], index: 10, kind: input, shape index: {}]   ;;  %s1294_s11 = inlined_call_operand.vmem [shape: f32[2,1,1], index: 11, kind: output, shape index: {}]  }
   0x1   :  { %v16_v0 = vstv %s1293_s10 }
   0x2   :  { %17 = vst [vmem:[#allocation3] sm:$0x1] %v16_v0 }
   0x3 LB: > { %s921_s20 = sadd.s32 4294967295, %s1078_s19   ;;  %p925_p0 = scmp.ge.s32.totalorder %s1078_s19, 1  ;;  %s1078_s19 = sphi %s1146_s19, %s23_s19  }
   0x4   : > { %p338_p1 = scmp.lt.s32.totalorder %s1078_s19, 3 }
   0x6   : > { %p339_p2 = pnand %p925_p0, %p338_p1 }
   0x7   : > { %p375_p3 = scmp.lt.s32.totalorder (!%p339_p2), %s921_s20, 1  ;;  %s1081_s24 = smov (!%p339_p2), 4  }
   0x8   : > { %342 = sbr.rel (%p339_p2) target bundleno = 1490 (0x5d2), region = 64  ;;  %s1082_s25 = smov (!%p339_p2), 8  }
   0xd   : > { %vm383_vm0 = vcmask 31744   ;;  %v1080_v1 = vmov 0.0   ;;  %s1296_s20 = smov (!%p375_p3, %s921_s20), 1  ;;  %v937_v8 = vld [vmem:[%s1284_s1 + $0x8] sm:$0xf]  ;;  %vm418_vm1 = vcmask 1045504  }
   0xe   : > { %384 = vst.msk [vmem:[#allocation2] sm:$0xff] %vm383_vm0, %v1080_v1  ;;  %s926_s10 = sshll.u32 %s1296_s20, 3  ;;  %v1025_v9 = vld [vmem:[%s1284_s1 + $0x8] sm:$0x30]  ;;  %v929_v12 = vld [vmem:[%s1284_s1] sm:$0xf]  ;;  %s381_s13 = scalar_lea.vmem %s1294_s11, %s1296_s20 }
   0xf   : > { %385 = vst.msk [vmem:[#allocation2 + $0x8] sm:$0xff] %vm383_vm0, %v1080_v1  ;;  %s378_s23 = scalar_lea.vmem %s1283_s0, %s926_s10  ;;  %v938_v10 = vor.u32 %v1025_v9, %v937_v8  ;;  %v1024_v13 = vld [vmem:[%s1284_s1] sm:$0x30]  ;;  %v945_v14 = vld [vmem:[%s1284_s1 + $0x10] sm:$0xf]  ;;  %vm400_vm2 = vcmask 64512  }
  0x10   : > { %v386_v2 = vld [vmem:[%s378_s23] sm:$0xff]  ;;  %v930_v15 = vor.u32 %v1024_v13, %v929_v12  ;;  %v1026_v16 = vld [vmem:[%s1284_s1 + $0x10] sm:$0x30]  ;;  %vm414_vm3 = vcmask 97280   ;;  %v1028_v37 = vld [vmem:[%s1286_s3 + $0x8] sm:$0xff]  ;;  %vm545_vm4 = vcmask 261120  }
  0x11   : > { %387 = vst.msk [vmem:[#allocation2 + $0x4] sm:$0xff] %vm383_vm0, %v386_v2  ;;  %v463_v11 = vsel %vm418_vm1, %v938_v10, 0  ;;  %v946_v17 = vor.u32 %v1026_v16, %v945_v14  ;;  %v1030_v38 = vld [vmem:[%s1287_s4 + $0x8] sm:$0xff]  ;;  %555 = vmatpush.bf16.msra.mxu3 %v1028_v37  ;;  %v1027_v40 = vld [vmem:[%s1286_s3] sm:$0xff]  ;;  %v1034_v43 = vld [vmem:[%s1286_s3 + $0x18] sm:$0xff]  ;;  %vm631_vm5 = vcmask 130048  }
  0x12   : > { %472 = vmatpush.bf16.msra.mxu1 %v463_v11  ;;  %v420_v18 = vsel %vm418_vm1, %v930_v15, 0  ;;  %v1032_v39 = vld [vmem:[%s1288_s5 + $0x8] sm:$0xff]  ;;  %v1029_v41 = vld [vmem:[%s1287_s4] sm:$0xff]  ;;  %v1036_v44 = vld [vmem:[%s1287_s4 + $0x18] sm:$0xff]  ;;  %vm667_vm6 = vcmask 1043456   ;;  %vm866_vm7 = vcmask 122880  }
  0x13   : > { %429 = vmatpush.bf16.msra.mxu0 %v420_v18  ;;  %v506_v19 = vsel %vm418_vm1, %v946_v17, 0  ;;  %v1031_v42 = vld [vmem:[%s1288_s5] sm:$0xff]  ;;  %v1033_v45 = vld [vmem:[%s1286_s3 + $0x10] sm:$0xff]  ;;  %v1038_v10 = vld [vmem:[%s1288_s5 + $0x18] sm:$0xff]  ;;  %vm872_vm8 = vcmask 0  }
  0x14   : > { %515 = vmatpush.bf16.msra.mxu2 %v506_v19  ;;  %v1035_v46 = vld [vmem:[%s1287_s4 + $0x10] sm:$0xff]  ;;  %v1056_v48 = vld [vmem:[%s1285_s2] ss:$0 sm:$0xff]  ;;  %v1055_v49 = vld [vmem:[%s1285_s2 + $0x1] ss:$0 sm:$0xff] }
  0x15   : > { %556 = vmatpush.bf16.msra.mxu3 %v1027_v40  ;;  %v1057_v54 = vld [vmem:[%s1285_s2 + $0x2] ss:$0 sm:$0xff]  ;;  %v1058_v2 = vld [vmem:[%s1290_s7] ss:$0 sm:$0xff]  ;;  %v1037_v16 = vld [vmem:[%s1288_s5 + $0x10] sm:$0xff] }
  0x16   : > { %621 = vmatpush.bf16.msrb.mxu1 %v1032_v39  ;;  %v1060_v9 = vld [vmem:[%s1289_s6] ss:$0 sm:$0xff] }
  0x17   : > { %588 = vmatpush.bf16.msrb.mxu0 %v1030_v38 }
  0x18   : > { %v389_v3 = vld [vmem:[#allocation2 + $0x4] sm:$0xff] }
  0x19   : > { %v438_v4 = vld [vmem:[#allocation2 + $0x6] sm:$0xff]  ;;  %392 = vrot.lane.b32.xlu0 %v389_v3, %s1081_s24  ;;  %v1059_v3 = vld [vmem:[%s1291_s8] ss:$0 sm:$0xff] }
  0x1a   : > { %440 = vrot.lane.b32.xlu1 %v438_v4, %s1082_s25  ;;  %v390_v5 = vld [vmem:[#allocation2 + $0x5] sm:$0xff]  ;;  %622 = vmatpush.bf16.msrb.mxu1 %v1031_v42 }
  0x1b   : > { %v481_v6 = vld [vmem:[#allocation2 + $0x8] sm:$0xff]  ;;  %v480_v26 = vld [vmem:[#allocation2] sm:$0xff]  ;;  %589 = vmatpush.bf16.msrb.mxu0 %v1029_v41 }
  0x1c   : > { %v1050_v7 = vpack.i.bf16 %v390_v5, %v481_v6  ;;  %v437_v20 = vld [vmem:[#allocation2 + $0x2] sm:$0xff] }
  0x1d   : > { %v388_v27 = vld [vmem:[#allocation2 + $0x3] sm:$0xff] }
  0x21   : > { %1051 = vrot.lane.b32.xlu0 %v1050_v7, %s1082_s25 }
  0x8b   : > { %v393_v21 = vpop.permute.xlu0 %392 }
  0x8c   : > { %v441_v22 = vpop.permute.xlu1 %440  ;;  %v443_v23 = vsel %vm383_vm0, %v437_v20, %v393_v21  ;;  %v399_v31 = vsel %vm383_vm0, %v388_v27, %v393_v21  ;;  %v486_v32 = vsel %vm383_vm0, %v480_v26, %v393_v21 }
  0x8d   : > { %v444_v24 = vsel %vm400_vm2, %v443_v23, %v441_v22  ;;  %v1062_v22 = vld [vmem:[%s1290_s7 + $0x1] ss:$0 sm:$0xff] }
  0x8e   : > { %v445_v25 = vpack.c.bf16 %v444_v24, %v444_v24 }
  0x90   : > { %939 = vmatmul.msk.bf16.vlgmr.msra.gmra.mxu1 %vm414_vm3, %v445_v25 }
  0x91   : > { %758 = vmatpush.bf16.msra.mxu1 %v1036_v44 }
  0x93   : > { %v1052_v28 = vpop.permute.xlu0 %1051 }
  0x94   : > { %v1054_v29 = vunpack.i.h.bf16 %v1052_v28  ;;  %v1053_v30 = vunpack.i.l.bf16 %v1052_v28 }
  0x95   : > { %759 = vmatpush.bf16.msra.mxu1 %v1035_v46 }
  0x96   : > { %v401_v33 = vsel %vm400_vm2, %v399_v31, %v1054_v29  ;;  %v487_v34 = vsel %vm400_vm2, %v486_v32, %v1053_v30 }
  0x97   : > { %v402_v35 = vpack.c.bf16 %v401_v33, %v401_v33  ;;  %v488_v36 = vpack.c.bf16 %v487_v34, %v487_v34  ;;  %v1063_v33 = vld [vmem:[%s1291_s8 + $0x1] ss:$0 sm:$0xff] }
  0x99   : > { %931 = vmatmul.msk.bf16.vlgmr.msra.gmra.mxu0 %vm414_vm3, %v402_v35  ;;  %947 = vmatmul.msk.bf16.vlgmr.msra.gmra.mxu2 %vm414_vm3, %v488_v36 }
  0x9a   : > { %723 = vmatpush.bf16.msra.mxu0 %v1034_v43 }
  0x9e   : > { %724 = vmatpush.bf16.msra.mxu0 %v1033_v45 }
 0x10d   : > { %v474_v47 = vpop.f32.mrf.mxu1 }
 0x10e   : > { %v475_v53 = vadd.f32 %v1055_v49, %v474_v47 }
 0x110   : > { %v478_v57 = vmax.f32 %v475_v53, 0.0 }
 0x115   : > { %v476_v50 = vpop.f32.mrf.mxu1 }
 0x116   : > { %v431_v51 = vpop.f32.mrf.mxu0 }
 0x117   : > { %v432_v52 = vadd.f32 %v1056_v48, %v431_v51  ;;  %v1061_v48 = vld [vmem:[%s1289_s6 + $0x1] ss:$0 sm:$0xff] }
 0x119   : > { %v435_v55 = vmax.f32 %v432_v52, 0.0 }
 0x11b   : > { %v479_v60 = vadd.f32 %v478_v57, %v435_v55 }
 0x11c   : > { %v517_v56 = vpop.f32.mrf.mxu2 }
 0x11d   : > { %v518_v58 = vadd.f32 %v1057_v54, %v517_v56 }
 0x11e   : > { %v433_v59 = vpop.f32.mrf.mxu0 }
 0x11f   : > { %v521_v61 = vmax.f32 %v518_v58, 0.0 }
 0x121   : > { %v522_v62 = vadd.f32 %v521_v61, %v479_v60 }
 0x123   : > { %v523_v63 = vmul.f32 0.33333334, %v522_v62 }
 0x124   : > { %v519_v0 = vpop.f32.mrf.mxu2 }
 0x125   : > { %v524_v1 = vpack.c.bf16 %v523_v63, %v523_v63 }
 0x127   : > { %956 = vmatmul.msk.bf16.vlgmr.msra.gmra.mxu3 %vm545_vm4, %v524_v1  ;;  %965 = vmatmul.msk.bf16.vlgmr.msrb.gmra.mxu0 %vm545_vm4, %v524_v1 }
 0x128   : > { %974 = vmatmul.msk.bf16.vlgmr.msrb.gmra.mxu1 %vm545_vm4, %v524_v1 }
 0x137   : > { %990 = vmatmul.msk.bf16.vlgmr.msra.gmra.mxu0 %vm545_vm4, %v524_v1 }
 0x138   : > { %1004 = vmatmul.msk.bf16.vlgmr.msra.gmra.mxu1 %vm545_vm4, %v524_v1 }
 0x1a4   : > { %v591_v4 = vpop.f32.mrf.mxu0 }
 0x1a5   : > { %v592_v5 = vadd.f32 %v1058_v2, %v591_v4  ;;  %v624_v6 = vpop.f32.mrf.mxu1 }
 0x1a6   : > { %v625_v7 = vadd.f32 %v1059_v3, %v624_v6 }
 0x1a7   : > { %v630_v8 = vpack.c.bf16 %v592_v5, %v592_v5 }
 0x1a8   : > { %v663_v11 = vpack.c.bf16 %v625_v7, %v625_v7 }
 0x1a9   : > { %v636_v12 = vsel %vm631_vm5, %v630_v8, 0 }
 0x1aa   : > { %v558_v13 = vpop.f32.mrf.mxu3  ;;  %645 = vmatpush.bf16.xpose.msrb.mxu2 %v636_v12  ;;  %v669_v14 = vsel %vm667_vm6, %v663_v11, 0 }
 0x1ab   : > { %v559_v15 = vadd.f32 %v1060_v9, %v558_v13  ;;  %678 = vmatpush.bf16.msrb.mxu3 %v669_v14 }
 0x1ac   : > { %v593_v17 = vpop.f32.mrf.mxu0 }
 0x1ad   : > { %v628_v18 = vmul.f32 0.25, %v559_v15  ;;  %v626_v19 = vpop.f32.mrf.mxu1 }
 0x1ae   : > { %v692_v19 = vld [vmem:[%s1292_s9] sm:$0x1] }
 0x1af   : > { %v629_v20 = vpack.c.bf16 %v628_v18, %v628_v18 }
 0x1b1   : > { %975 = vmatmul.msk.bf16.vlgmr.msrb.gmra.mxu2 %vm631_vm5, %v629_v20  ;;  %v1021_v20 = vld [vmem:[%s1292_s9 + $0x1] sm:$0x1] }
 0x1b2   : > { %793 = vmatpush.bf16.msra.mxu2 %v1038_v10  ;;  %v560_v21 = vpop.f32.mrf.mxu3 }
 0x1b4   : > { %v726_v23 = vpop.f32.mrf.mxu0 }
 0x1b5   : > { %v761_v24 = vpop.f32.mrf.mxu1  ;;  %v727_v49 = vadd.f32 %v1061_v48, %v726_v23 }
 0x1b6   : > { %794 = vmatpush.bf16.msra.mxu2 %v1037_v16  ;;  %v762_v25 = vadd.f32 %v1062_v22, %v761_v24 }
 0x1b7   : > { %v800_v50 = vmul.f32 0.25, %v727_v49 }
 0x1b8   : > { %v802_v26 = vpack.c.bf16 %v762_v25, %v762_v25 }
 0x1b9   : > { %v801_v51 = vpack.c.bf16 %v800_v50, %v800_v50 }
 0x1ba   : > { %v807_v27 = vsel %vm631_vm5, %v802_v26, 0  ;;  %v870_v26 = vld [vmem:[#allocation3] sm:$0x1] }
 0x1bb   : > { %816 = vmatpush.bf16.xpose.msra.mxu3 %v807_v27 }
 0x1bc   : > { %v728_v28 = vpop.f32.mrf.mxu0 }
 0x1bd   : > { %v763_v29 = vpop.f32.mrf.mxu1 }
 0x1c1   : > { %1018 = vmatmul.msk.bf16.vlgmr.msra.gmra.mxu2 %vm545_vm4, %v524_v1 }
 0x234   : > { %v647_v30 = vpop.f32.mrf.mxu2 }
 0x235   : > { %v651_v31 = vsel %vm400_vm2, %v647_v30, -inf }
 0x236   : > { %652 = vmax.xlane.f32.xlu1 %v651_v31 }
 0x23c   : > { %v649_v32 = vpop.f32.mrf.mxu2 }
 0x244   : > { %v796_v34 = vpop.f32.mrf.mxu2 }
 0x245   : > { %v797_v35 = vadd.f32 %v1063_v33, %v796_v34 }
 0x247   : > { %v834_v36 = vpack.c.bf16 %v797_v35, %v797_v35 }
 0x249   : > { %v839_v37 = vsel %vm667_vm6, %v834_v36, 0 }
 0x24a   : > { %848 = vmatpush.bf16.msrb.mxu0 %v839_v37 }
 0x24c   : > { %v798_v38 = vpop.f32.mrf.mxu2 }
 0x2a9   : > { %v653_v39 = vpop.xlane.xlu1 %652 }
 0x2aa   : > { %v654_v40 = vsub.f32 %v647_v30, %v653_v39 }
 0x2ac   : > { %v655_v41 = vmul.f32 1.442695, %v654_v40 }
 0x2ae   : > { %1064 = vpow2.f32 %v655_v41 }
 0x2b4   : > { %v1065_v42 = vpop.eup %1064 }
 0x2b5   : > { %v657_v43 = vsel %vm400_vm2, %v1065_v42, 0.0 }
 0x2b6   : > { %658 = vadd.xlane.f32.xlu2 %v657_v43 }
 0x329   : > { %v659_v44 = vpop.xlane.xlu2 %658 }
 0x32a   : > { %1066 = vrcp.f32 %v659_v44 }
 0x330   : > { %v1067_v45 = vpop.eup %1066 }
 0x331   : > { %v661_v46 = vmul.f32 %v1067_v45, %v1065_v42 }
 0x333   : > { %v662_v47 = vpack.c.bf16 %v661_v46, %v661_v46 }
 0x335   : > { %976 = vmatmul.msk.bf16.vlgmr.msrb.gmra.mxu3 %vm400_vm2, %v662_v47 }
 0x345   : > { %1019 = vmatmul.msk.bf16.vlgmr.msra.gmra.mxu3 %vm631_vm5, %v801_v51 }
 0x3b8   : > { %v680_v52 = vpop.f32.mrf.mxu3 }
 0x3b9   : > { %v684_v2 = vsel %vm631_vm5, %v680_v52, 0.0 }
 0x3ba   : > { %v685_v3 = vrot.slane %v684_v2, 4 }
 0x3bc   : > { %v686_v4 = vadd.f32 %v685_v3, %v684_v2 }
 0x3be   : > { %v687_v5 = vrot.slane %v686_v4, 2 }
 0x3c0   : > { %v682_v53 = vpop.f32.mrf.mxu3  ;;  %v688_v6 = vadd.f32 %v687_v5, %v686_v4 }
 0x3c2   : > { %v689_v10 = vrot.slane %v688_v6, 1 }
 0x3c4   : > { %v690_v13 = vadd.f32 %v689_v10, %v688_v6 }
 0x3c6   : > { %v691_v17 = vmul.f32 0.125, %v690_v13 }
 0x3c8   : > { %v818_v54 = vpop.f32.mrf.mxu3  ;;  %v693_v22 = vmul.f32 %v692_v19, %v691_v17 }
 0x3c9   : > { %v822_v55 = vsel %vm400_vm2, %v818_v54, -inf }
 0x3ca   : > { %823 = vmax.xlane.f32.xlu2 %v822_v55 }
 0x3d0   : > { %v820_v56 = vpop.f32.mrf.mxu3 }
 0x43d   : > { %v824_v57 = vpop.xlane.xlu2 %823 }
 0x43e   : > { %v825_v58 = vsub.f32 %v818_v54, %v824_v57 }
 0x440   : > { %v826_v59 = vmul.f32 1.442695, %v825_v58 }
 0x442   : > { %1068 = vpow2.f32 %v826_v59 }
 0x448   : > { %v1069_v60 = vpop.eup %1068 }
 0x449   : > { %v828_v61 = vsel %vm400_vm2, %v1069_v60, 0.0 }
 0x44a   : > { %829 = vadd.xlane.f32.xlu0 %v828_v61 }
 0x4bd   : > { %v830_v62 = vpop.xlane.xlu0 %829 }
 0x4be   : > { %1070 = vrcp.f32 %v830_v62 }
 0x4c4   : > { %v1071_v63 = vpop.eup %1070 }
 0x4c5   : > { %v832_v0 = vmul.f32 %v1071_v63, %v1069_v60 }
 0x4c7   : > { %v833_v1 = vpack.c.bf16 %v832_v0, %v832_v0 }
 0x4c9   : > { %1020 = vmatmul.msk.bf16.vlgmr.msrb.gmra.mxu0 %vm400_vm2, %v833_v1 }
 0x546   : > { %v850_v7 = vpop.f32.mrf.mxu0 }
 0x547   : > { %v854_v8 = vsel %vm631_vm5, %v850_v7, 0.0 }
 0x548   : > { %v855_v9 = vrot.slane %v854_v8, 4 }
 0x54a   : > { %v856_v11 = vadd.f32 %v855_v9, %v854_v8 }
 0x54c   : > { %v857_v12 = vrot.slane %v856_v11, 2 }
 0x54e   : > { %v858_v14 = vadd.f32 %v857_v12, %v856_v11  ;;  %v852_v15 = vpop.f32.mrf.mxu0 }
 0x550   : > { %v859_v16 = vrot.slane %v858_v14, 1 }
 0x552   : > { %v860_v18 = vadd.f32 %v859_v16, %v858_v14 }
 0x554   : > { %v861_v21 = vmul.f32 0.125, %v860_v18 }
 0x556   : > { %v864_v23 = vmul.f32 %v1021_v20, %v861_v21 }
 0x558   : > { %v865_v24 = vadd.f32 %v864_v23, %v693_v22 }
 0x55a   : > { %v867_v25 = vsel %vm866_vm7, %v865_v24, 0.0 }
 0x55b   : > { %868 = vadd.xlane.f32.xlu2 %v867_v25 }
 0x5ce   : > { %v869_v27 = vpop.xlane.xlu2 %868 }
 0x5cf   : > { %v871_v28 = vadd.f32 %v870_v26, %v869_v27 }
 0x5d1   : > { %873 = vst.msk [vmem:[%s381_s13] sm:$0x1] %vm872_vm8, %v871_v28 }
 0x5d2 PF: > { %s23_s19 = sadd.s32 1, %s1078_s19  }
 0x5d3   : > { %p20_p4 = scmp.ge.s32.totalorder %s23_s19, 4  }
 0x5d5   :  { %22 = sbr.rel (!%p20_p4) target bundleno = 3 (0x3), region = 105 }

</bundles_post_ra>
